<compile_context>
chip_gen: v5e
topology: v5e:2x2
jax: 0.10.0
libtpu: 0.0.40
codegen_flags: <defaults>
</compile_context>

<pallas_src>
import functools

import jax
import jax.numpy as jnp
from jax.experimental import pallas as pl
from jax.experimental.pallas import tpu as pltpu


def _round_up(n, m):
    return ((n + m - 1) // m) * m


def _cdiv(a, b):
    return -(-a // b)


def _hinge_sum_kernel(b_ref, x_ref, y_ref, w_ref, out_ref, acc_ref, *,
                      total_b, tb, spr, tiles_per_core):
    """One grid step: accumulate hinge terms for a (tb, row_width) packed tile.

    Grid is (num_cores, tiles_per_core); axis 0 is 'parallel' (per-TensorCore
    partial sums), axis 1 is the 'arbitrary' batch reduction.
    """
    c = pl.program_id(0)
    i = pl.program_id(1)

    @pl.when(i == 0)
    def _init():
        acc_ref[...] = jnp.zeros_like(acc_ref)

    # Scores for the spr samples packed in every 128-lane row, via the MXU
    # (block-diagonal RHS).  x keeps its input dtype in HBM/VMEM (bf16 input
    # halves the dominant HBM stream); promotion to f32 happens in-vreg.
    x = x_ref[...].astype(jnp.float32)                      # (tb, row_width)
    w_bd = w_ref[...].astype(jnp.float32)                   # (row_width, spr)
    scores = jnp.dot(x, w_bd, preferred_element_type=jnp.float32) + b_ref[0]

    y = y_ref[...]                                          # (tb, spr) f32
    hinge = jnp.maximum(0.0, 1.0 - y * scores)              # (tb, spr)

    # Global tile index (cores own contiguous chunks of packed rows).
    gidx = c * tiles_per_core + i
    needs_mask = (gidx + 1) * tb * spr > total_b

    @pl.when(jnp.logical_not(needs_mask))
    def _acc_full():
        # Full tile: plain elementwise accumulate, no masking work at all.
        acc_ref[...] += hinge

    @pl.when(needs_mask)
    def _acc_masked():
        # Only tiles overlapping the batch end pay for the mask.
        row = jax.lax.broadcasted_iota(jnp.int32, (tb, spr), 0)
        col = jax.lax.broadcasted_iota(jnp.int32, (tb, spr), 1)
        sample = (gidx * tb + row) * spr + col
        acc_ref[...] += jnp.where(sample < total_b, hinge, 0.0)

    @pl.when(i == tiles_per_core - 1)
    def _finalize():
        # Single cross-lane/sublane reduce per core, not per tile.
        out_ref[...] = jnp.sum(acc_ref[...]).reshape(1, 1, 1)


def _auto_tile_rows(row_width, x_itemsize, granule, budget_bytes):
    """Pick packed-row tile size from the lane-PADDED VMEM footprint."""
    lanes_x = _round_up(row_width, 128)
    per_row = 2 * lanes_x * x_itemsize      # x block, double-buffered
    per_row += 2 * 128 * 4                  # y block (spr lanes padded to 128)
    per_row += 128 * 4                      # accumulator scratch (single)
    rows = (budget_bytes // per_row) // granule * granule
    return max(granule, rows)


def strategic_hinge_loss(x, y, w, b, regularization_lambda=0.01, *,
                         tile_rows=None, num_cores=1,
                         vmem_budget_bytes=32 * 1024 * 1024,
                         vmem_limit_bytes=48 * 1024 * 1024):
    """Mean hinge loss of a linear strategic model + lambda * ||w||^2."""
    B, D = x.shape
    y_flat = jnp.reshape(y, (-1,)).astype(jnp.float32)
    w_flat = jnp.reshape(w, (-1,)).astype(jnp.float32)

    # Lane-dense packing: spr samples per 128-lane row when D divides 128.
    # Fallback (128 % D != 0 or D >= 128): one sample per row of width D.
    # TODO(synk): the fallback keeps a lane-sparse (tb, 1) score/hinge
    #             pipeline; fine for large D where the x stream dominates.
    if D < 128 and 128 % D == 0:
        spr = 128 // D
    else:
        spr = 1
    row_width = D * spr

    pad = (-B) % spr
    if pad:
        # TODO(synk): this pad copies x once through HBM; callers that care
        #             should supply B as a multiple of 128 // D.
        x = jnp.pad(x, ((0, pad), (0, 0)))
        y_flat = jnp.pad(y_flat, (0, pad))
    Bp = B + pad
    R = (Bp * D) // row_width                         # packed rows
    x_view = jnp.reshape(x, (R, row_width))           # row-major, free
    y_view = jnp.reshape(y_flat, (R, spr))
    # Block-diagonal weights: column j holds w for the j-th sample in a row.
    w_bd = jnp.kron(jnp.eye(spr, dtype=jnp.float32), w_flat.reshape(D, 1))
    b_arr = jnp.asarray([b], dtype=jnp.float32)

    # Sublane granule depends on the x dtype (f32: 8, bf16: 16, int8/fp8: 32).
    granule = {4: 8, 2: 16, 1: 32}.get(jnp.dtype(x.dtype).itemsize, 8)
    if tile_rows is None:
        tile_rows = _auto_tile_rows(row_width, jnp.dtype(x.dtype).itemsize,
                                    granule, vmem_budget_bytes)
    tb = _round_up(max(1, min(int(tile_rows), R)), granule)

    nblocks = _cdiv(R, tb)
    C = max(1, int(num_cores))
    if nblocks < C:                                   # not enough work to split
        C = 1
    T = _cdiv(nblocks, C)                             # tiles per core
    last_block = nblocks - 1

    # Trailing over-coverage tiles are clamped to the last real block (and
    # fully masked in-kernel), so the DMA never reads out of bounds.
    def row_block_index(c, i):
        return (jnp.minimum(c * T + i, last_block), 0)

    cost = pl.CostEstimate(
        flops=2 * R * row_width * spr,
        transcendentals=0,
        bytes_accessed=int(x_view.size * jnp.dtype(x_view.dtype).itemsize
                           + y_view.size * 4 + w_bd.size * 4 + 4 * C),
    )

    kernel = functools.partial(_hinge_sum_kernel, total_b=B, tb=tb, spr=spr,
                               tiles_per_core=T)

    partials = pl.pallas_call(
        kernel,
        out_shape=jax.ShapeDtypeStruct((C, 1, 1), jnp.float32),
        grid=(C, T),
        in_specs=[
            pl.BlockSpec(memory_space=pltpu.MemorySpace.SMEM),   # [bias]
            pl.BlockSpec((tb, row_width), row_block_index),      # packed x
            pl.BlockSpec((tb, spr), row_block_index),            # packed y
            pl.BlockSpec((row_width, spr), lambda c, i: (0, 0)),  # block-diag w
        ],
        out_specs=pl.BlockSpec((1, 1, 1), lambda c, i: (c, 0, 0)),
        scratch_shapes=[pltpu.VMEM((tb, spr), jnp.float32)],      # wide acc
        compiler_params=pltpu.CompilerParams(
            dimension_semantics=("parallel", "arbitrary"),
            vmem_limit_bytes=vmem_limit_bytes,
        ),
        cost_estimate=cost,
    )(b_arr, x_view, y_view, w_bd)

    # Mean + regularization applied exactly once, on the per-core partials.
    reg = regularization_lambda * jnp.sum(w_flat * w_flat)
    return jnp.sum(partials) / float(B) + reg


def _reference_loss(x, y, w, b, lam):
    xf = x.astype(jnp.float32)
    wf = jnp.reshape(w, (-1,)).astype(jnp.float32)
    s = jnp.dot(xf, wf, precision=jax.lax.Precision.HIGHEST) + b
    hinge = jnp.maximum(0.0, 1.0 - jnp.reshape(y, (-1,)).astype(jnp.float32) * s)
    return jnp.mean(hinge) + lam * jnp.sum(wf * wf)


if __name__ == "__main__":
    key = jax.random.PRNGKey(0)
    k1, k2, k3, k4, k5, k6 = jax.random.split(key, 6)
    D = 32

    # Case 1: f32, B=100 -> packed rows R=25, tile_rows=8 -> grid (1, 4).
    # Exercises multi-tile wide-accumulator reduction, a partial trailing
    # block, and the pl.when-gated masking (full tiles skip the mask).
    B1 = 100
    x1 = jax.random.normal(k1, (B1, D), dtype=jnp.float32)
    y1 = jnp.where(jax.random.uniform(k2, (B1,)) > 0.5, 1.0, -1.0).astype(jnp.float32)
    w1 = jax.random.normal(k3, (D,), dtype=jnp.float32) * 0.1
    b1, lam1 = 0.05, 0.01
    loss1 = jax.block_until_ready(
        strategic_hinge_loss(x1, y1, w1, b1, lam1, tile_rows=8))
    ref1 = _reference_loss(x1, y1, w1, b1, lam1)
    assert jnp.allclose(loss1, ref1, rtol=5e-3, atol=5e-3), (loss1, ref1)

    # Case 2: bf16 activations (halves the dominant HBM stream) with two
    # partial-sum "cores" (grid (2, 2)) -- the v7x megacore layout; on 1-TC
    # chips the parallel axis just iterates sequentially, and the clamped,
    # fully-masked trailing tile of core 1 is exercised.
    B2 = 160
    x2 = jax.random.normal(k4, (B2, D), dtype=jnp.float32).astype(jnp.bfloat16)
    y2 = jnp.where(jax.random.uniform(k5, (B2,)) > 0.5, 1.0, -1.0).astype(jnp.float32)
    w2 = jax.random.normal(k6, (D,), dtype=jnp.float32) * 0.1
    b2, lam2 = -0.1, 0.05
    loss2 = jax.block_until_ready(
        strategic_hinge_loss(x2, y2, w2, b2, lam2, tile_rows=16, num_cores=2))
    ref2 = _reference_loss(x2, y2, w2, b2, lam2)
    assert jnp.allclose(loss2, ref2, rtol=5e-3, atol=5e-3), (loss2, ref2)

    print("KERNEL_OK")
</pallas_src>

<mosaic_0001>
module attributes {stable_mosaic.version = 11 : i64} {
  func.func @_hinge_sum_kernel(%arg0: i32, %arg1: i32, %arg2: memref<1xf32, #tpu.memory_space<smem>>, %arg3: memref<8x128xf32, #tpu.memory_space<vmem>>, %arg4: memref<8x4xf32, #tpu.memory_space<vmem>>, %arg5: memref<128x4xf32, #tpu.memory_space<vmem>>, %arg6: memref<1x1x1xf32, #tpu.memory_space<vmem>>, %arg7: memref<8x4xf32, #tpu.memory_space<vmem>>) attributes {dimension_semantics = [#tpu.dimension_semantics<parallel>, #tpu.dimension_semantics<arbitrary>], iteration_bounds = array<i64: 1, 4>, scalar_prefetch = 0 : i64, scratch_operands = 1 : i64, tpu.core_type = #tpu.core_type<tc>, window_params = [{transform_indices = @transform_0, window_bounds = array<i64: 1>}, {transform_indices = @transform_1, window_bounds = array<i64: 8, 128>}, {transform_indices = @transform_2, window_bounds = array<i64: 8, 4>}, {pipeline_mode = #tpu.pipeline_mode<synchronous>, transform_indices = @transform_3, window_bounds = array<i64: 128, 4>}, {transform_indices = @transform_4, window_bounds = array<i64: 1, 1, 1>}]} {
    %c0_i32 = arith.constant 0 : i32
    %0 = arith.cmpi eq, %arg1, %c0_i32 : i32
    %1 = arith.extui %0 : i1 to i32
    %c0_i32_0 = arith.constant 0 : i32
    %2 = arith.cmpi ne, %1, %c0_i32_0 : i32
    scf.if %2 {
      %cst_13 = arith.constant 0.000000e+00 : f32
      %29 = vector.broadcast %cst_13 : f32 to vector<8x4xf32>
      %c0_14 = arith.constant 0 : index
      %c0_15 = arith.constant 0 : index
      %30 = vector.load %arg7[%c0_14, %c0_15] : memref<8x4xf32, #tpu.memory_space<vmem>>, vector<8x4xf32>
      tpu.vector_store %arg7[%c0_14, %c0_15], %29 {strides = array<i32>} : memref<8x4xf32, #tpu.memory_space<vmem>>, vector<8x4xf32>,
    } else {
    }
    %c0 = arith.constant 0 : index
    %c0_1 = arith.constant 0 : index
    %3 = vector.load %arg3[%c0, %c0_1] : memref<8x128xf32, #tpu.memory_space<vmem>>, vector<8x128xf32>
    %c0_2 = arith.constant 0 : index
    %c0_3 = arith.constant 0 : index
    %4 = vector.load %arg5[%c0_2, %c0_3] : memref<128x4xf32, #tpu.memory_space<vmem>>, vector<128x4xf32>
    %cst = arith.constant dense<0.000000e+00> : vector<8x4xf32>
    %5 = tpu.matmul %3, %4, %cst {dimension_numbers = #tpu.dot_dimension_numbers<[1], [0], [0], [1], [0, 0, 1, 1], [], []>} : vector<8x128xf32>, vector<128x4xf32>, vector<8x4xf32> -> vector<8x4xf32>
    %c0_4 = arith.constant 0 : index
    %6 = memref.load %arg2[%c0_4] : memref<1xf32, #tpu.memory_space<smem>>
    %7 = vector.broadcast %6 : f32 to vector<8x4xf32>
    %8 = arith.addf %5, %7 : vector<8x4xf32>
    %c0_5 = arith.constant 0 : index
    %c0_6 = arith.constant 0 : index
    %9 = vector.load %arg4[%c0_5, %c0_6] : memref<8x4xf32, #tpu.memory_space<vmem>>, vector<8x4xf32>
    %10 = arith.mulf %9, %8 : vector<8x4xf32>
    %cst_7 = arith.constant 1.000000e+00 : f32
    %11 = vector.broadcast %cst_7 : f32 to vector<8x4xf32>
    %12 = arith.subf %11, %10 : vector<8x4xf32>
    %cst_8 = arith.constant 0.000000e+00 : f32
    %13 = vector.broadcast %cst_8 : f32 to vector<8x4xf32>
    %14 = arith.maximumf %13, %12 : vector<8x4xf32>
    %c4_i32 = arith.constant 4 : i32
    %15 = arith.muli %arg0, %c4_i32 : i32
    %16 = arith.addi %15, %arg1 : i32
    %c1_i32 = arith.constant 1 : i32
    %17 = arith.addi %16, %c1_i32 : i32
    %c8_i32 = arith.constant 8 : i32
    %18 = arith.muli %17, %c8_i32 : i32
    %c4_i32_9 = arith.constant 4 : i32
    %19 = arith.muli %18, %c4_i32_9 : i32
    %c100_i32 = arith.constant 100 : i32
    %20 = arith.cmpi sgt, %19, %c100_i32 : i32
    %true = arith.constant true
    %21 = arith.xori %20, %true : i1
    %22 = arith.extui %21 : i1 to i32
    %c0_i32_10 = arith.constant 0 : i32
    %23 = arith.cmpi ne, %22, %c0_i32_10 : i32
    scf.if %23 {
      %c0_13 = arith.constant 0 : index
      %c0_14 = arith.constant 0 : index
      %29 = vector.load %arg7[%c0_13, %c0_14] : memref<8x4xf32, #tpu.memory_space<vmem>>, vector<8x4xf32>
      %30 = arith.addf %29, %14 : vector<8x4xf32>
      %c0_15 = arith.constant 0 : index
      %c0_16 = arith.constant 0 : index
      %31 = vector.load %arg7[%c0_15, %c0_16] : memref<8x4xf32, #tpu.memory_space<vmem>>, vector<8x4xf32>
      tpu.vector_store %arg7[%c0_15, %c0_16], %30 {strides = array<i32>} : memref<8x4xf32, #tpu.memory_space<vmem>>, vector<8x4xf32>,
    } else {
    }
    %24 = arith.extui %20 : i1 to i32
    %c0_i32_11 = arith.constant 0 : i32
    %25 = arith.cmpi ne, %24, %c0_i32_11 : i32
    scf.if %25 {
      %29 = tpu.iota {dimensions = array<i32: 0>} : vector<8x4xi32>
      %30 = tpu.iota {dimensions = array<i32: 1>} : vector<8x4xi32>
      %c8_i32_13 = arith.constant 8 : i32
      %31 = arith.muli %16, %c8_i32_13 : i32
      %32 = vector.broadcast %31 : i32 to vector<8x4xi32>
      %33 = arith.addi %32, %29 : vector<8x4xi32>
      %c4_i32_14 = arith.constant 4 : i32
      %34 = vector.broadcast %c4_i32_14 : i32 to vector<8x4xi32>
      %35 = arith.muli %33, %34 : vector<8x4xi32>
      %36 = arith.addi %35, %30 : vector<8x4xi32>
      %c0_15 = arith.constant 0 : index
      %c0_16 = arith.constant 0 : index
      %37 = vector.load %arg7[%c0_15, %c0_16] : memref<8x4xf32, #tpu.memory_space<vmem>>, vector<8x4xf32>
      %c100_i32_17 = arith.constant 100 : i32
      %38 = vector.broadcast %c100_i32_17 : i32 to vector<8x4xi32>
      %39 = arith.cmpi slt, %36, %38 : vector<8x4xi32>
      %cst_18 = arith.constant 0.000000e+00 : f32
      %40 = vector.broadcast %cst_18 : f32 to vector<8x4xf32>
      %41 = arith.select %39, %14, %40 : vector<8x4xi1>, vector<8x4xf32>
      %42 = arith.addf %37, %41 : vector<8x4xf32>
      %c0_19 = arith.constant 0 : index
      %c0_20 = arith.constant 0 : index
      %43 = vector.load %arg7[%c0_19, %c0_20] : memref<8x4xf32, #tpu.memory_space<vmem>>, vector<8x4xf32>
      tpu.vector_store %arg7[%c0_19, %c0_20], %42 {strides = array<i32>} : memref<8x4xf32, #tpu.memory_space<vmem>>, vector<8x4xf32>,
    } else {
    }
    %c3_i32 = arith.constant 3 : i32
    %26 = arith.cmpi eq, %arg1, %c3_i32 : i32
    %27 = arith.extui %26 : i1 to i32
    %c0_i32_12 = arith.constant 0 : i32
    %28 = arith.cmpi ne, %27, %c0_i32_12 : i32
    scf.if %28 {
      %c0_13 = arith.constant 0 : index
      %c0_14 = arith.constant 0 : index
      %29 = vector.load %arg7[%c0_13, %c0_14] : memref<8x4xf32, #tpu.memory_space<vmem>>, vector<8x4xf32>
      %30 = vector.shape_cast %29 : vector<8x4xf32> to vector<1x8x4xf32>
      %cst_15 = arith.constant dense<0.000000e+00> : vector<1xf32>
      %31 = vector.multi_reduction <add>, %30, %cst_15 [1, 2] : vector<1x8x4xf32> to vector<1xf32>
      %32 = vector.shape_cast %31 : vector<1xf32> to vector<1x1x1xf32>
      %33 = vector.extract %32[0, 0, 0] : f32 from vector<1x1x1xf32>
      %34 = vector.broadcast %33 : f32 to vector<1x1x1xf32>
      %c0_16 = arith.constant 0 : index
      %c0_17 = arith.constant 0 : index
      %c0_18 = arith.constant 0 : index
      %35 = vector.load %arg6[%c0_16, %c0_17, %c0_18] : memref<1x1x1xf32, #tpu.memory_space<vmem>>, vector<1x1x1xf32>
      tpu.vector_store %arg6[%c0_16, %c0_17, %c0_18], %34 {strides = array<i32>} : memref<1x1x1xf32, #tpu.memory_space<vmem>>, vector<1x1x1xf32>,
    } else {
    }
    return
  }
  func.func @transform_0(%arg0: i32, %arg1: i32) -> i32 {
    %c0_i32 = arith.constant 0 : i32
    %c0_i32_0 = arith.constant 0 : i32
    return %c0_i32 : i32
  }
  func.func @transform_1(%arg0: i32, %arg1: i32) -> (i32, i32) {
    %c4_i32 = arith.constant 4 : i32
    %0 = arith.muli %arg0, %c4_i32 : i32
    %1 = arith.addi %0, %arg1 : i32
    %c3_i32 = arith.constant 3 : i32
    %2 = arith.minsi %1, %c3_i32 : i32
    %c0_i32 = arith.constant 0 : i32
    %c0_i32_0 = arith.constant 0 : i32
    return %2, %c0_i32 : i32, i32
  }
  func.func @transform_2(%arg0: i32, %arg1: i32) -> (i32, i32) {
    %c4_i32 = arith.constant 4 : i32
    %0 = arith.muli %arg0, %c4_i32 : i32
    %1 = arith.addi %0, %arg1 : i32
    %c3_i32 = arith.constant 3 : i32
    %2 = arith.minsi %1, %c3_i32 : i32
    %c0_i32 = arith.constant 0 : i32
    %c0_i32_0 = arith.constant 0 : i32
    return %2, %c0_i32 : i32, i32
  }
  func.func @transform_3(%arg0: i32, %arg1: i32) -> (i32, i32) {
    %c0_i32 = arith.constant 0 : i32
    %c0_i32_0 = arith.constant 0 : i32
    %c0_i32_1 = arith.constant 0 : i32
    return %c0_i32, %c0_i32_0 : i32, i32
  }
  func.func @transform_4(%arg0: i32, %arg1: i32) -> (i32, i32, i32) {
    %c0_i32 = arith.constant 0 : i32
    %c0_i32_0 = arith.constant 0 : i32
    %c0_i32_1 = arith.constant 0 : i32
    return %arg0, %c0_i32, %c0_i32_0 : i32, i32, i32
  }
}

</mosaic_0001>

<bundles_post_ra>
// kernel: tpu_custom_call.1
= control target key start
LH: loop header
LB: loop body
LE: loop exit
PB: predicated region body
PF: predicated region fallthrough
CT: control target
= control target key end

     0   :  { %s687_s0 = inlined_call_operand.<no memory space> [shape: f32[1], index: 0, kind: input, shape index: {}]   ;;  %s688_s1 = inlined_call_operand.vmem [shape: f32[25,128], index: 1, kind: input, shape index: {}]   ;;  %s689_s2 = inlined_call_operand.vmem [shape: f32[25,4], index: 2, kind: input, shape index: {}]   ;;  %s690_s3 = inlined_call_operand.vmem [shape: f32[128,4], index: 3, kind: input, shape index: {}]   ;;  %s691_s4 = inlined_call_operand.hbm [shape: f32[1,1,1], index: 4, kind: output, shape index: {}]  }
   0x1   :  { %9 = sst [smem:[#allocation3]] %s687_s0 }
   0x2   :  { %10 = vsyncpa [#allocation5], 0  ;;  %s586_s17 = smov 0   ;;  %s588_s18 = smov 0  }
   0x3   :  { %s590_s19 = smov 0  }
   0x4 LB: > { %s442_s0 = sadd.s32 4294967295, %s554_s19   ;;  %s25_s20 = sadd.s32 1, %s550_s18  ;;  %s554_s19 = sphi %s590_s19, %s16_s19   ;;  %s550_s18 = sphi %s588_s18, %s693_s18   ;;  %s546_s17 = sphi %s586_s17, %s692_s17  }
   0x5   : > { %p26_p0 = scmp.ge.s32.totalorder %s25_s20, 4  ;;  %p445_p1 = scmp.ge.s32.totalorder %s554_s19, 1 }
   0x6   : > { %p216_p2 = scmp.lt.s32.totalorder %s554_s19, 5 }
   0x7   : > { %s695_s20 = smov (%p26_p0, %s25_s20), 0 }
   0x8   : > { %p217_p3 = pnand %p445_p1, %p216_p2 }
   0x9   : > { %p250_p4 = scmp.lt.s32.totalorder (!%p217_p3), %s546_s17, 3  ;;  %p454_p5 = scmp.ne.s32.totalorder (!%p217_p3), %s546_s17, 0 }
   0xa   : > { %220 = sbr.rel (%p217_p3) target bundleno = 409 (0x199), region = 36 }
   0xf   : > { %s251_s21 = scalar_select %p250_p4, %s546_s17, 3 }
  0x10   : > { %275 = sbr.rel (%p454_p5) target bundleno = 23 (0x17), region = 40 }
  0x11   : > { %s697_s21 = smov (!%p250_p4, %s251_s21), 3 }
  0x12   : > { %s449_s22 = sshll.u32 %s697_s21, 3 }
  0x13   : > { %s612_s25 = scalar_lea.vmem %s688_s1, %s449_s22  ;;  %s617_s28 = scalar_lea.vmem %s689_s2, %s449_s22 }
  0x15   : > { %vm276_vm0 = vcmask 31744   ;;  %v556_v0 = vmov 0.0  }
  0x16   : > { %277 = vst.msk [vmem:[#allocation2] sm:$0xff] %vm276_vm0, %v556_v0 }
  0x17 PF: > { %v294_v1 = vld [vmem:[%s690_s3 + $0x78] sm:$0xff]  ;;  %v293_v2 = vld [vmem:[%s690_s3 + $0x70] sm:$0xff]  ;;  %v292_v3 = vld [vmem:[%s690_s3 + $0x68] sm:$0xff]  ;;  %s464_s15 = sshll.u32 %s546_s17, 5  ;;  %s295_s21 = sld [smem:[#allocation3]] }
  0x18   : > { %297 = vmatpush.msra.mxu0 %v294_v1  ;;  %v291_v4 = vld [vmem:[%s690_s3 + $0x60] sm:$0xff]  ;;  %v290_v5 = vld [vmem:[%s690_s3 + $0x58] sm:$0xff]  ;;  %v289_v6 = vld [vmem:[%s690_s3 + $0x50] sm:$0xff]  ;;  %s465_s16 = sadd.s32 32, %s464_s15 }
  0x19   : > { %v288_v7 = vld [vmem:[%s690_s3 + $0x48] sm:$0xff]  ;;  %v287_v8 = vld [vmem:[%s690_s3 + $0x40] sm:$0xff]  ;;  %v286_v9 = vld [vmem:[%s690_s3 + $0x38] sm:$0xff]  ;;  %p456_p6 = scmp.gt.s32.totalorder %s465_s16, 100 }
  0x1a   : > { %298 = vmatpush.msra.mxu0 %v293_v2  ;;  %v285_v10 = vld [vmem:[%s690_s3 + $0x30] sm:$0xff]  ;;  %v284_v11 = vld [vmem:[%s690_s3 + $0x28] sm:$0xff]  ;;  %v283_v12 = vld [vmem:[%s690_s3 + $0x20] sm:$0xff] }
  0x1b   : > { %v282_v13 = vld [vmem:[%s690_s3 + $0x18] sm:$0xff]  ;;  %v281_v14 = vld [vmem:[%s690_s3 + $0x10] sm:$0xff]  ;;  %v280_v15 = vld [vmem:[%s690_s3 + $0x8] sm:$0xff] }
  0x1c   : > { %299 = vmatpush.msra.mxu0 %v292_v3  ;;  %v279_v16 = vld [vmem:[%s690_s3] sm:$0xff] }
  0x1d   : > { %v278_v17 = vld [vmem:[%s612_s25] sm:$0xff]  ;;  %v296_v18 = vstv %s295_s21 }
  0x1e   : > { %300 = vmatpush.msra.mxu0 %v291_v4  ;;  %v317_v20 = vld [vmem:[%s617_s28] sm:$0xff] }
  0x20   : > { %301 = vmatpush.msra.mxu0 %v290_v5 }
  0x22   : > { %302 = vmatpush.msra.mxu0 %v289_v6 }
  0x24   : > { %303 = vmatpush.msra.mxu0 %v288_v7 }
  0x26   : > { %304 = vmatpush.msra.mxu0 %v287_v8 }
  0x28   : > { %305 = vmatpush.msra.mxu0 %v286_v9 }
  0x2a   : > { %306 = vmatpush.msra.mxu0 %v285_v10 }
  0x2c   : > { %307 = vmatpush.msra.mxu0 %v284_v11 }
  0x2e   : > { %308 = vmatpush.msra.mxu0 %v283_v12 }
  0x30   : > { %309 = vmatpush.msra.mxu0 %v282_v13 }
  0x32   : > { %310 = vmatpush.msra.mxu0 %v281_v14 }
  0x34   : > { %311 = vmatpush.msra.mxu0 %v280_v15 }
  0x36   : > { %312 = vmatpush.msra.mxu0 %v279_v16 }
  0x37   : > { %313 = vmatmul.f32.vlgmr.msra.gmra.mxu0 %v278_v17 }
  0xb4   : > { %v314_v19 = vpop.f32.mrf.mxu0 }
  0xb5   : > { %v315_v21 = vadd.f32 %v314_v19, %v296_v18 }
  0xb7   : > { %v318_v22 = vmul.f32 %v317_v20, %v315_v21  ;;  %329 = sbr.rel (%p456_p6) target bundleno = 192 (0xc0), region = 44 }
  0xb9   : > { %v319_v23 = vsub.f32 1.0, %v318_v22 }
  0xbb   : > { %v320_v24 = vmax.f32 %v319_v23, 0.0 }
  0xbc   : > { %v330_v25 = vld [vmem:[#allocation2] sm:$0xff]  ;;  %vm332_vm1 = vcmask 31744  }
  0xbd   : > { %v331_v26 = vadd.f32 %v330_v25, %v320_v24 }
  0xbf   : > { %333 = vst.msk [vmem:[#allocation2] sm:$0xff] %vm332_vm1, %v331_v26 }
  0xc0 PF: > { %p457_p7 = scmp.le.s32.totalorder %s465_s16, 100 }
  0xc1   : > { %s458_s25 = sshll.u32 (!%p457_p7), %s546_s17, 3 }
  0xc2   : > { %336 = sbr.rel (%p457_p7) target bundleno = 214 (0xd6), region = 48 }
  0xc7   : > { %v337_v27 = vlaneseq  ;;  %v342_v28 = vstv %s458_s25  ;;  %v346_v34 = vld [vmem:[#allocation2] sm:$0xff]  ;;  %vm350_vm3 = vcmask 31744  }
  0xc9   : > { %v338_v29 = vshrl.u32 %v337_v27, 7  ;;  %v340_v30 = vand.u32 127, %v337_v27 }
  0xcb   : > { %v343_v31 = vadd.s32 %v342_v28, %v338_v29 }
  0xcd   : > { %v344_v32 = vmul.u32 4, %v343_v31 }
  0xcf   : > { %v345_v33 = vadd.s32 %v344_v32, %v340_v30 }
  0xd1   : > { %vm347_vm2 = vcmp.lt.s32.totalorder %v345_v33, 100 }
  0xd2   : > { %v348_v35 = vsel %vm347_vm2, %v320_v24, 0.0 }
  0xd3   : > { %v349_v36 = vadd.f32 %v348_v35, %v346_v34 }
  0xd5   : > { %351 = vst.msk [vmem:[#allocation2] sm:$0xff] %vm350_vm3, %v349_v36 }
  0xd6 PF: > { %p459_p8 = scmp.ne.s32.totalorder %s546_s17, 3 }
  0xd8   : > { %355 = sbr.rel (%p459_p8) target bundleno = 403 (0x193), region = 52 }
  0xdd   : > { %v356_v37 = vld [vmem:[#allocation2] sm:$0xff]  ;;  %vm357_vm4 = vcmask 31744   ;;  %vm369_vm5 = vcmask 0  }
  0xde   : > { %v358_v38 = vsel %vm357_vm4, %v356_v37, 0.0 }
  0xdf   : > { %359 = vadd.xlane.f32.xlu0 %v358_v38 }
 0x152   : > { %v360_v39 = vpop.xlane.xlu0 %359 }
 0x153   : > { %v361_v40 = vrot.slane %v360_v39, 4 }
 0x155   : > { %v362_v41 = vadd.f32 %v361_v40, %v360_v39 }
 0x157   : > { %v363_v42 = vrot.slane %v362_v41, 2 }
 0x159   : > { %v364_v43 = vadd.f32 %v363_v42, %v362_v41 }
 0x15b   : > { %v365_v44 = vrot.slane %v364_v43, 1 }
 0x15d   : > { %v366_v45 = vadd.f32 %v365_v44, %v364_v43 }
 0x15f   : > { %466 = vpush %v366_v45 }
 0x190   : > { %s467_s28 = spop %466 }
 0x191   : > { %v368_v46 = vstv %s467_s28 }
 0x192   : > { %370 = vst.msk [vmem:[#allocation4] sm:$0x1] %vm369_vm5, %v368_v46 }
 0x193 PF: > { %p472_p9 = scmp.eq.s32.totalorder %s442_s0, 3  ;;  %s380_s23 = sshll.u32 %s691_s4, 4  ;;  %s381_s23 = int_to_ptr.hbm [resolvable:$true] %s380_s23 }
 0x194   : > { %s557_s24 = smov [#allocation4]  }
 0x195   : > { %s378_s26 = sshll.u32 %s557_s24, 4  ;;  %s379_s26 = int_to_ptr.vmem [resolvable:$true] %s378_s26 }
 0x196   : > { %469 = dma.vmem_to_hbm [thread:$0]  (%p472_p9), %s379_s26, 16, %s381_s23, [#allocation5]  }
 0x197   : > { %541 = dma.done.wait (%p472_p9), [#allocation5], 16  }
 0x198   : > { %543 = vsyncadd (%p472_p9), [#allocation5], 4294967280 }
 0x199 PF: > { %s16_s19 = sadd.s32 1, %s554_s19   ;;  %s692_s17 = smov %s550_s18 }
 0x19a   : > { %p13_p10 = scmp.ge.s32.totalorder %s16_s19, 6   ;;  %s693_s18 = smov %s695_s20 }
 0x19c   :  { %15 = sbr.rel (!%p13_p10) target bundleno = 4 (0x4), region = 83 }
 0x1a1   :  { %394 = vsyncpa [#allocation5], 1 }
 0x1a2   :  { %396 = vsyncpa [#allocation5 + $0x1], 1 }

</bundles_post_ra>
